<compile_context>
chip_gen: v7x
topology: tpu7x:2x2x1
jax: 0.10.0
libtpu: 0.0.40
codegen_flags: <defaults>
</compile_context>

<pallas_src>
import functools
import math

import jax
import jax.numpy as jnp
from jax.experimental import pallas as pl
from jax.experimental.pallas import tpu as pltpu


def make_positional_table(max_seq_len: int, embed_dim: int) -> jnp.ndarray:
    """Deterministic pe buffer, identical to the PyTorch __init__ double loop."""
    pos = jnp.arange(max_seq_len, dtype=jnp.float32)[:, None]     # [L, 1]
    k = jnp.arange(embed_dim, dtype=jnp.float32)[None, :]         # [1, D]
    denom = jnp.power(10000.0, 2.0 * k / float(embed_dim))        # raw column k
    angle = pos / denom                                           # [L, D]
    even_mask = (jnp.arange(embed_dim) % 2 == 0)[None, :]
    pe = jnp.where(even_mask, jnp.sin(angle), jnp.cos(angle))
    return pe.astype(jnp.float32)                                 # [L, D]


def _choose_tiles_2d(rows: int, cols: int, itemsize: int,
                     sublane_q: int, target_bytes: int):
    """Pick an (8,128)-legal (tr, tc) for a cdiv grid over a (rows, cols) slab."""
    # --- lane (last-dim) tile: multiple of 128, or the full extent ---
    if cols <= 128:
        tc = cols
    else:
        tc = (cols // 128) * 128                    # largest 128-multiple <= cols
        # Keep >=2 column blocks (>=4 on big inputs) so the pipeline has steps
        # to overlap DMA/compute and v7x megacore can split a parallel axis.
        want_blocks = 4 if cols >= 2048 else 2
        cap_blocks = (pl.cdiv(cols, want_blocks) // 128) * 128
        if cap_blocks >= 128:
            tc = min(tc, cap_blocks)
        # ~target_bytes per buffer assuming the minimum row tile.
        cap_bytes = (target_bytes // (sublane_q * itemsize) // 128) * 128
        tc = max(128, min(tc, cap_bytes))
    # --- sublane tile: full extent when small, else a multiple of the quantum ---
    if rows <= sublane_q:
        tr = rows
    else:
        cap_bytes = (target_bytes // (tc * itemsize) // sublane_q) * sublane_q
        tr = max(sublane_q, min((rows // sublane_q) * sublane_q, cap_bytes))
    return tr, tc


def _pos_embed_kernel(x_ref, pe_ref, o_ref, *, scale: float):
    # One vreg-pass: vld(x) + vld(pe, broadcast/resident) + vmul + vadd + vst.
    o_ref[...] = (x_ref[...] * scale + pe_ref[...]).astype(o_ref.dtype)


def positional_embedding_forward(x: jnp.ndarray, pe: jnp.ndarray,
                                 embed_dim: int,
                                 use_pallas: bool | None = None) -> jnp.ndarray:
    """x: [B, S, D], pe: [max_seq_len, D] -> [B, S, D]."""
    B, S, D = x.shape
    if S > pe.shape[0]:
        raise ValueError(
            f"seq_len={S} exceeds the positional table max_seq_len={pe.shape[0]}")
    scale = math.sqrt(embed_dim)
    pe_slice = pe[:S, :].astype(x.dtype)          # same dtype as x on every path

    if use_pallas is None:
        use_pallas = x.size >= (1 << 18)          # tiny -> XLA fusion wins
    if not use_pallas:
        return (x * scale + pe_slice[None, :, :]).astype(x.dtype)

    itemsize = jnp.dtype(x.dtype).itemsize
    sublane_q = max(8, 32 // itemsize)            # 8 for f32, 16 for bf16
    # ~4 MiB per buffer: double-buffered x+out+pe (incl. sublane padding of the
    # pe tile) stays <= ~24 MiB -> fits the 32 MiB scoped VMEM cap on v7x and
    # the explicit 32 MiB limit below (v5e's scoped default is only 16 MiB).
    target_bytes = 4 << 20

    # Token-major layout avoids sublane-padding waste when batch < quantum and
    # the embedding dim is lane-dense.
    token_major = (B < sublane_q and D % 128 == 0 and S % sublane_q == 0
                   and S * 128 * itemsize <= target_bytes)

    if token_major:
        rows, cols = B * S, D
        x2 = x.reshape(rows, cols)
        pe2 = pe_slice                                        # (S, D)
        tr = S                                                # one batch per row block
        tc = max(128, min((D // 128) * 128,
                          (target_bytes // (S * itemsize) // 128) * 128))
        if D >= 256:                                          # keep >=2 col blocks
            tc = min(tc, max(128, (pl.cdiv(D, 2) // 128) * 128))
        pe_block = (tr, tc)
    else:
        rows, cols = B, S * D
        x2 = x.reshape(rows, cols)
        pe2 = pe_slice.reshape(1, cols)
        tr, tc = _choose_tiles_2d(rows, cols, itemsize, sublane_q, target_bytes)
        pe_block = (1, tc)

    n_col, n_row = pl.cdiv(cols, tc), pl.cdiv(rows, tr)
    kernel = functools.partial(_pos_embed_kernel, scale=scale)

    out2 = pl.pallas_call(
        kernel,
        out_shape=jax.ShapeDtypeStruct((rows, cols), x.dtype),
        grid_spec=pltpu.PrefetchScalarGridSpec(
            num_scalar_prefetch=0,
            # rows innermost -> the shared pe block index (0, j) is constant
            # across consecutive steps, so the pe tile stays resident.
            grid=(n_col, n_row),
            in_specs=[
                pl.BlockSpec((tr, tc), lambda j, i: (i, j)),   # x tile
                pl.BlockSpec(pe_block, lambda j, i: (0, j)),   # shared pe tile
            ],
            out_specs=pl.BlockSpec((tr, tc), lambda j, i: (i, j)),
        ),
        compiler_params=pltpu.CompilerParams(
            dimension_semantics=("parallel", "parallel"),
            vmem_limit_bytes=32 * 1024 * 1024,
        ),
    )(x2, pe2)

    return out2.reshape(B, S, D)


if __name__ == "__main__":
    # Small shapes consistent with the module: batch=2, seq=8, embed_dim=32.
    batch, seq_len, embed_dim = 2, 8, 32
    max_seq_len = 16

    key = jax.random.PRNGKey(0)
    x = jax.random.normal(key, (batch, seq_len, embed_dim), dtype=jnp.float32)
    pe = make_positional_table(max_seq_len, embed_dim)

    # Sanity: the table matches the literal PyTorch double loop.
    pe_loop = [[math.sin(p / 10000 ** (2 * i / embed_dim)) if i % 2 == 0
                else math.cos(p / 10000 ** (2 * i / embed_dim))
                for i in range(embed_dim)] for p in range(max_seq_len)]
    assert jnp.allclose(pe, jnp.array(pe_loop, dtype=jnp.float32), atol=1e-6)

    # Path 1: (B, S*D) slab layout (D < 128). Force Pallas at demo size.
    out = positional_embedding_forward(x, pe, embed_dim, use_pallas=True)
    out = jax.block_until_ready(out)
    ref = x * math.sqrt(embed_dim) + pe[None, :seq_len, :]
    assert out.shape == (batch, seq_len, embed_dim)
    assert jnp.allclose(out, ref, atol=1e-5, rtol=1e-5)

    # Path 2: token-major (B*S, D) layout (B < 8, D % 128 == 0).
    embed_dim2 = 128
    x_b = jax.random.normal(jax.random.PRNGKey(0),
                            (batch, seq_len, embed_dim2), dtype=jnp.float32)
    pe_b = make_positional_table(max_seq_len, embed_dim2)
    out_b = jax.block_until_ready(
        positional_embedding_forward(x_b, pe_b, embed_dim2, use_pallas=True))
    ref_b = x_b * math.sqrt(embed_dim2) + pe_b[None, :seq_len, :]
    assert jnp.allclose(out_b, ref_b, atol=1e-5, rtol=1e-5)

    print("KERNEL_OK")
</pallas_src>

<mosaic_0001>
module attributes {stable_mosaic.version = 11 : i64} {
  func.func @_pos_embed_kernel(%arg0: i32, %arg1: i32, %arg2: memref<2x128xf32, #tpu.memory_space<vmem>>, %arg3: memref<1x128xf32, #tpu.memory_space<vmem>>, %arg4: memref<2x128xf32, #tpu.memory_space<vmem>>) attributes {dimension_semantics = [#tpu.dimension_semantics<parallel>, #tpu.dimension_semantics<parallel>], iteration_bounds = array<i64: 2, 1>, scalar_prefetch = 0 : i64, scratch_operands = 0 : i64, tpu.core_type = #tpu.core_type<tc>, window_params = [{transform_indices = @transform_0, window_bounds = array<i64: 2, 128>}, {transform_indices = @transform_1, window_bounds = array<i64: 1, 128>}, {transform_indices = @transform_2, window_bounds = array<i64: 2, 128>}]} {
    %c0 = arith.constant 0 : index
    %c0_0 = arith.constant 0 : index
    %0 = vector.load %arg2[%c0, %c0_0] : memref<2x128xf32, #tpu.memory_space<vmem>>, vector<2x128xf32>
    %cst = arith.constant 5.65685415 : f32
    %1 = vector.broadcast %cst : f32 to vector<2x128xf32>
    %2 = arith.mulf %0, %1 : vector<2x128xf32>
    %c0_1 = arith.constant 0 : index
    %c0_2 = arith.constant 0 : index
    %3 = vector.load %arg3[%c0_1, %c0_2] : memref<1x128xf32, #tpu.memory_space<vmem>>, vector<1x128xf32>
    %4 = vector.broadcast %3 : vector<1x128xf32> to vector<2x128xf32>
    %5 = arith.addf %2, %4 : vector<2x128xf32>
    %c0_3 = arith.constant 0 : index
    %c0_4 = arith.constant 0 : index
    %6 = vector.load %arg4[%c0_3, %c0_4] : memref<2x128xf32, #tpu.memory_space<vmem>>, vector<2x128xf32>
    tpu.vector_store %arg4[%c0_3, %c0_4], %5 {strides = array<i32>} : memref<2x128xf32, #tpu.memory_space<vmem>>, vector<2x128xf32>,
    return
  }
  func.func @transform_0(%arg0: i32, %arg1: i32) -> (i32, i32) {
    %c0_i32 = arith.constant 0 : i32
    return %arg1, %arg0 : i32, i32
  }
  func.func @transform_1(%arg0: i32, %arg1: i32) -> (i32, i32) {
    %c0_i32 = arith.constant 0 : i32
    %c0_i32_0 = arith.constant 0 : i32
    return %c0_i32, %arg0 : i32, i32
  }
  func.func @transform_2(%arg0: i32, %arg1: i32) -> (i32, i32) {
    %c0_i32 = arith.constant 0 : i32
    return %arg1, %arg0 : i32, i32
  }
}

</mosaic_0001>

<bundles_post_ra>
// kernel: tpu_custom_call.1
= control target key start
LH: loop header
LB: loop body
LE: loop exit
PB: predicated region body
PF: predicated region fallthrough
CT: control target
= control target key end

     0   :  { %7 = vsyncpa [#allocation3], 0  ;;  %s693_s0 = inlined_call_operand.hbm [shape: f32[2,256], index: 0, kind: input, shape index: {}]   ;;  %s694_s1 = inlined_call_operand.vmem [shape: f32[1,256], index: 1, kind: input, shape index: {}]   ;;  %s695_s2 = inlined_call_operand.hbm [shape: f32[2,256], index: 2, kind: output, shape index: {}]  }
   0x1   :  { %9 = vsyncpa [#allocation3 + $0x1], 0 }
   0x2   :  { %10 = vsyncpa [#allocation4], 0 }
   0x3   :  { %12 = vsyncpa [#allocation4 + $0x1], 0  ;;  %s516_s9 = smov 0   ;;  %s518_s10 = smov 0  }
   0x4   :  { %s520_s11 = smov 0   ;;  %s522_s12 = smov 0  }
   0x5   :  { %s524_s13 = smov 0   ;;  %s526_s14 = smov 0  }
   0x6 LB: > { %s309_s15 = sadd.s32 4294967295, %s497_s14   ;;  %s310_s16 = sadd.s32 4294967294, %s497_s14   ;;  %s497_s14 = sphi %s526_s14, %s18_s14   ;;  %s493_s13 = sphi %s524_s13, %s711_s13   ;;  %s489_s12 = sphi %s522_s12, %s710_s12   ;;  %s485_s11 = sphi %s520_s11, %s709_s11   ;;  %s481_s10 = sphi %s518_s10, %s708_s10   ;;  %s477_s9 = sphi %s516_s9, %s707_s9  }
   0x7   : > { %s30_s17 = sadd.s32 1, %s493_s13  ;;  %s39_s18 = sadd.s32 1, %s485_s11 }
   0x8   : > { %p32_p0 = scmp.ge.s32.totalorder %s30_s17, 2  ;;  %p46_p1 = scmp.ne.s32.totalorder %s485_s11, %s481_s10 }
   0x9   : > { %p47_p2 = scmp.eq.s32.totalorder %s497_s14, 0  ;;  %p52_p3 = scmp.ne.s32.totalorder %s481_s10, %s477_s9 }
   0xa   : > { %s713_s17 = smov (%p32_p0, %s30_s17), 0  ;;  %p53_p5 = scmp.eq.s32.totalorder %s309_s15, 0 }
   0xb   : > { %p557_p4 = por %p47_p2, %p46_p1  ;;  %s35_s20 = ssub.s32 %s493_s13, %s713_s17 }
   0xc   : > { %p104_p6 = scmp.eq.s32.totalorder %s309_s15, 1  ;;  %p37_p7 = scmp.eq.s32.totalorder %s35_s20, 0 }
   0xd   : > { %p563_p8 = por %p53_p5, %p52_p3  ;;  %p110_p10 = scmp.eq.s32.totalorder %s310_s16, 1 }
   0xe   : > { %p567_p9 = por %p104_p6, %p46_p1  ;;  %p335_p13 = scmp.lt.s32.totalorder %s497_s14, 2 }
   0xf   : > { %s572_s23 = scalar_select %p37_p7, %s485_s11, %s39_s18  }
  0x10   : > { %s699_s22 = scalar_select %p567_p9, 1, 0 }
  0x11   : > { %p574_p11 = por %p110_p10, %p52_p3  ;;  %s130_s25 = sand.u32 1, %s485_s11  }
  0x12   : > { %s313_s26 = sshll.u32 %s130_s25, 1  ;;  %s314_s27 = sshll.u32 %s493_s13, 5 }
  0x13   : > { %s700_s24 = scalar_select %p574_p11, 1, 0 }
  0x14   : > { %s585_s30 = scalar_lea.hbm %s693_s0, %s314_s27  ;;  %s134_s3 = scalar_lea.vmem [#allocation2], %s313_s26 }
  0x15   : > { %s143_s4 = sshll.u32 %s134_s3, 4  ;;  %p591_p0 = pnand %p335_p13, %p557_p4  ;;  %s587_s4 = int_to_ptr.vmem [resolvable:$true] %s143_s4 }
  0x16   : > { %s131_s6 = scalar_lea.sflag [#allocation3], %s130_s25  ;;  %s385_s7 = scalar_lea.hbm %s585_s30, 32 }
  0x17   : > { %p386_p3 = scmp.ne.s32.totalorder %s585_s30, %s385_s7  ;;  %p387_p5 = pneg %p591_p0 }
  0x18   : > { %s390_s16 = scalar_lea.hbm %s693_s0, 64  ;;  %p391_p4 = scmp.lt.u32.totalorder %s585_s30, %s693_s0 }
  0x19   : > { %p388_p6 = pnand %p387_p5, %p386_p3  ;;  %p392_p10 = scmp.lt.u32.totalorder %s390_s16, %s385_s7 }
  0x1a   : > { %p394_p12 = scmp.lt.u32.totalorder %s385_s7, %s585_s30 }
  0x1b   : > { %p389_p7 = pneg %p388_p6  ;;  %p393_p13 = por %p392_p10, %p391_p4 }
  0x1d   : > { %p395_p1 = por %p394_p12, %p393_p13 }
  0x1f   : > { %p396_p2 = pnand %p395_p1, %p389_p7 }
  0x21   : > { %399 = shalt.err (!%p396_p2)
}
  0x22   : > { %s400_s20 = scalar_lea.vmem %s587_s4, 32  ;;  %s499_s25 = smov [#allocation2]  }
  0x23   : > { %p401_p3 = scmp.ne.s32.totalorder %s587_s4, %s400_s20  ;;  %s405_s26 = sshll.u32 %s499_s25, 4  ;;  %s406_s26 = int_to_ptr.vmem [resolvable:$false] %s405_s26 }
  0x24   : > { %s407_s27 = scalar_lea.vmem %s406_s26, 64  ;;  %p408_p9 = scmp.lt.s32.totalorder %s587_s4, %s406_s26 }
  0x25   : > { %p403_p6 = pnand %p401_p3, %p387_p5  ;;  %p409_p4 = scmp.lt.s32.totalorder %s407_s27, %s400_s20 }
  0x27   : > { %p404_p11 = pneg %p403_p6  ;;  %p410_p10 = por %p409_p4, %p408_p9 }
  0x29   : > { %p411_p12 = pnand %p410_p10, %p404_p11 }
  0x2b   : > { %414 = shalt.err (!%p411_p12)
}
  0x2c   : > { %330 = dma.hbm_to_vmem [thread:$0]  (!%p591_p0), %s585_s30, 32, %s587_s4, %s131_s6  }
  0x2d   : > { %p702_p1 = scmp.lt.s32.totalorder %s497_s14, 3  ;;  %p703_p2 = scmp.ge.s32.totalorder %s497_s14, 1 }
  0x2f   : > { %p155_p5 = pnand %p703_p2, %p702_p1 }
  0x30   : > { %s627_s28 = sand.u32 (!%p155_p5), 1, %s481_s10  }
  0x31   : > { %158 = sbr.rel (%p155_p5) target bundleno = 85 (0x55), region = 28  ;;  %s316_s29 = sshll.u32 (!%p155_p5), %s627_s28, 1 }
  0x32   : > { %s161_s3 = scalar_lea.sflag (!%p155_p5), [#allocation3], %s627_s28  ;;  %s164_s7 = scalar_lea.vmem (!%p155_p5), [#allocation2], %s316_s29 }
  0x38   : > { %468 = dma.done.wait (%p563_p8), %s161_s3, 32  }
  0x39   : > { %470 = vsyncadd (%p563_p8), %s161_s3, 4294967264  ;;  %p188_p9 = scmp.lt.s32.totalorder %s489_s12, 1  ;;  %v191_v0 = vld [vmem:[%s164_s7] sm:$0x3]  ;;  %s187_s8 = scalar_lea.vmem [#allocation5], %s316_s29 }
  0x3a   : > { %s218_s15 = sshll.u32 %s187_s8, 4  ;;  %s320_s16 = sshll.u32 %s489_s12, 5  ;;  %v192_v2 = vmul.f32 5.656854, %v191_v0  ;;  %s641_s15 = int_to_ptr.vmem [resolvable:$true] %s218_s15 }
  0x3b   : > { %s189_s30 = scalar_select %p188_p9, %s489_s12, 1 }
  0x3c   : > { %s646_s19 = scalar_lea.hbm %s695_s2, %s320_s16  ;;  %s203_s20 = scalar_lea.sflag [#allocation4], %s627_s28 }
  0x3d   : > { %s190_s6 = scalar_lea.vmem %s694_s1, %s189_s30  ;;  %s415_s25 = scalar_lea.vmem %s641_s15, 32 }
  0x3e   : > { %v318_v1 = vld [vmem:[%s190_s6] ss:$0 sm:$0xff]  ;;  %p416_p8 = scmp.ne.s32.totalorder %s641_s15, %s415_s25  ;;  %p704_p11 = scmp.ne.s32.totalorder %s699_s22, 0 }
  0x3f   : > { %v200_v3 = vadd.f32 %v318_v1, %v192_v2  ;;  %s500_s12 = smov [#allocation5]  }
  0x40   : > { %p417_p0 = pnand %p416_p8, %p704_p11  ;;  %s419_s26 = sshll.u32 %s500_s12, 4  ;;  %s420_s26 = int_to_ptr.vmem [resolvable:$false] %s419_s26 }
  0x41   : > { %201 = vst [vmem:[%s187_s8] sm:$0x3] %v200_v3  ;;  %s421_s27 = scalar_lea.vmem %s420_s26, 64  ;;  %p422_p13 = scmp.lt.s32.totalorder %s641_s15, %s420_s26 }
  0x42   : > { %p418_p7 = pneg %p417_p0  ;;  %p423_p3 = scmp.lt.s32.totalorder %s421_s27, %s415_s25 }
  0x44   : > { %p424_p6 = por %p423_p3, %p422_p13 }
  0x46   : > { %p425_p4 = pnand %p424_p6, %p418_p7 }
  0x48   : > { %428 = shalt.err (!%p425_p4)
}
  0x49   : > { %s429_s28 = scalar_lea.hbm %s646_s19, 32  ;;  %s433_s7 = scalar_lea.hbm %s695_s2, 64 }
  0x4a   : > { %p430_p10 = scmp.ne.s32.totalorder %s646_s19, %s429_s28  ;;  %p434_p2 = scmp.lt.u32.totalorder %s646_s19, %s695_s2 }
  0x4b   : > { %p435_p5 = scmp.lt.u32.totalorder %s433_s7, %s429_s28  ;;  %p437_p8 = scmp.lt.u32.totalorder %s429_s28, %s646_s19 }
  0x4c   : > { %p431_p12 = pnand %p430_p10, %p704_p11 }
  0x4d   : > { %p436_p9 = por %p435_p5, %p434_p2 }
  0x4e   : > { %p432_p1 = pneg %p431_p12 }
  0x4f   : > { %p438_p0 = por %p437_p8, %p436_p9 }
  0x51   : > { %p439_p7 = pnand %p438_p0, %p432_p1 }
  0x53   : > { %442 = shalt.err (!%p439_p7)
}
  0x54   : > { %325 = dma.vmem_to_hbm [thread:$0]  (%p704_p11), %s641_s15, 32, %s646_s19, %s203_s20  }
  0x55 PF: > { %s230_s5 = sand.u32 1, %s477_s9   ;;  %p705_p13 = scmp.ne.s32.totalorder %s700_s24, 0 }
  0x56   : > { %p706_p3 = scmp.ge.s32.totalorder %s497_s14, 2  ;;  %s231_s6 = scalar_lea.sflag [#allocation4], %s230_s5 }
  0x58   : > { %p332_p6 = pnand %p706_p3, %p705_p13 }
  0x5a   : > { %472 = dma.done.wait (!%p332_p6), %s231_s6, 32  }
  0x5b   : > { %474 = vsyncadd (!%p332_p6), %s231_s6, 4294967264  ;;  %s18_s14 = sadd.s32 1, %s497_s14   ;;  %s707_s9 = smov %s481_s10 }
  0x5c   : > { %p15_p4 = scmp.ge.s32.totalorder %s18_s14, 4   ;;  %s708_s10 = smov %s485_s11 }
  0x5d   : > { %s709_s11 = smov %s572_s23  ;;  %s710_s12 = smov %s493_s13 }
  0x5e   : > { %s711_s13 = smov %s713_s17  ;;  %17 = sbr.rel (!%p15_p4) target bundleno = 6 (0x6), region = 76 }
  0x65   :  { %236 = vsyncpa [#allocation3], 1 }
  0x66   :  { %238 = vsyncpa [#allocation3 + $0x1], 1 }
  0x67   :  { %239 = vsyncpa [#allocation4], 1 }
  0x68   :  { %241 = vsyncpa [#allocation4 + $0x1], 1 }

</bundles_post_ra>
